<compile_context>
chip_gen: v5e
topology: v5e:2x2
jax: 0.10.0
libtpu: 0.0.40
codegen_flags: <defaults>
</compile_context>

<pallas_src>
import functools

import jax
import jax.numpy as jnp
from jax.experimental import pallas as pl
from jax.experimental.pallas import tpu as pltpu


def _attention_kernel(x_ref, wqkv_ref, wproj_ref, bproj_ref, o_ref, *,
                      num_heads, in_dim):
    bt, n, dim = x_ref.shape
    hd = in_dim // num_heads

    # ---- fused QKV projection: (bt*N, dim) @ (dim, 3*in_dim); bf16 MXU, f32 accumulation.
    # The softmax qk scale is already folded into the q columns of wqkv (prepare_params).
    x2 = x_ref[...].reshape(bt * n, dim).astype(wqkv_ref.dtype)
    qkv = jnp.dot(x2, wqkv_ref[...], preferred_element_type=jnp.float32)  # (bt*n, 3*in_dim)

    q = qkv[:, 0 * in_dim:1 * in_dim].reshape(bt, n, in_dim)
    k = qkv[:, 1 * in_dim:2 * in_dim].reshape(bt, n, in_dim)
    # v kept 2-D: (bt*n, in_dim) already equals torch's v.transpose(1,2).reshape(B,N,in_dim),
    # so the residual add needs no data movement.
    v2 = qkv[:, 2 * in_dim:3 * in_dim]
    v = v2.reshape(bt, n, in_dim)
    v_bf = v.astype(jnp.bfloat16)                       # hoisted once for all heads

    # ---- per-head attention, batched over the bt images of this block.
    # Heads are unrolled: Mosaic's dot_general lowering handles a single (leading) batch
    # dim, so each head is one image-batched 3-D einsum. Head outputs are assembled as SSA
    # values with full-128-lane selects (no VMEM scratch, no masked narrow stores) and fed
    # straight into the proj matmul.
    # TODO(synk): attn_drop / proj_drop are identity at the module defaults (p=0.0);
    #             nonzero dropout would need pltpu.prng_seed / prng_random_bits masks.
    # TODO(synk): for N >> 256 this full-NxN-score formulation should become flash-style
    #             (online softmax over KV tiles); fine at the tiny N used here.
    col = jax.lax.broadcasted_iota(jnp.int32, (bt, n, in_dim), 2)
    y = jnp.zeros((bt, n, in_dim), jnp.float32)
    for h in range(num_heads):
        sl = slice(h * hd, (h + 1) * hd)
        s = jnp.einsum('bqd,bkd->bqk',
                       q[:, :, sl].astype(jnp.bfloat16),
                       k[:, :, sl].astype(jnp.bfloat16),
                       preferred_element_type=jnp.float32)           # (bt, n, n)
        s = s - jnp.max(s, axis=-1, keepdims=True)                   # stable softmax, f32
        e = jnp.exp(s)
        p = e * pl.reciprocal(jnp.sum(e, axis=-1, keepdims=True), approx=True)
        # Full-width PV matmul; columns outside head h are dropped by the select below,
        # keeping every vreg op / store at full lane density.
        oh = jnp.einsum('bqk,bkd->bqd', p.astype(jnp.bfloat16), v_bf,
                        preferred_element_type=jnp.float32)          # (bt, n, in_dim)
        y = jnp.where((col >= h * hd) & (col < (h + 1) * hd), oh, y)

    # ---- output projection + residual with v; single full-width store.
    proj = jnp.dot(y.reshape(bt * n, in_dim).astype(wproj_ref.dtype), wproj_ref[...],
                   preferred_element_type=jnp.float32)
    o_ref[...] = v2 + proj + bproj_ref[...]


def _pick_block_b(B, N, target_rows=1024, max_block=64):
    # Fold enough images per grid step that the Linear matmuls see a large M extent
    # (per-step overhead ~0.35 us), but keep >= 2 grid steps whenever B >= 2 so both
    # v7x TensorCores get work under dimension_semantics=("parallel",).
    bt = max(1, min(B, max_block, max(1, target_rows // max(N, 1))))
    if B >= 2:
        bt = min(bt, B // 2)
    bt = max(bt, 1)
    while B % bt:
        bt -= 1
    return bt


def prepare_params(params, *, dim, num_heads, qk_scale=None):
    """One-time weight prep (outside the hot path): fold the softmax scale into the q
    columns of the QKV weight and cast matmul weights to bf16 (MXU-native, half the DMA)."""
    in_dim = params["proj_w"].shape[0]
    # NOTE: the module's scale uses head_dim = dim // num_heads (the INPUT dim C), not
    # in_dim // num_heads — this matches T2T token_transformer; intentional, don't "fix".
    scale = float(qk_scale) if qk_scale is not None else float((dim // num_heads) ** -0.5)
    qkv_w = jnp.asarray(params["qkv_w"], jnp.float32)
    qkv_w = qkv_w.at[:, :in_dim].multiply(scale)        # scale folded into q projection
    return {
        "qkv_w": qkv_w.astype(jnp.bfloat16),
        "proj_w": jnp.asarray(params["proj_w"]).astype(jnp.bfloat16),
        "proj_b": jnp.asarray(params["proj_b"]).astype(jnp.float32),
    }


def attention_forward(x, prepared, *, num_heads):
    B, N, C = x.shape
    in_dim = prepared["proj_w"].shape[0]
    assert C == prepared["qkv_w"].shape[0]
    assert in_dim % num_heads == 0

    bt = _pick_block_b(B, N)
    grid = (B // bt,)

    kernel = functools.partial(_attention_kernel, num_heads=num_heads, in_dim=in_dim)
    out2d = pl.pallas_call(
        kernel,
        out_shape=jax.ShapeDtypeStruct((B * N, in_dim), jnp.float32),
        grid=grid,
        in_specs=[
            pl.BlockSpec((bt, N, C), lambda b: (b, 0, 0)),
            pl.BlockSpec((C, 3 * in_dim), lambda b: (0, 0)),
            pl.BlockSpec((in_dim, in_dim), lambda b: (0, 0)),
            pl.BlockSpec((1, in_dim), lambda b: (0, 0)),
        ],
        out_specs=pl.BlockSpec((bt * N, in_dim), lambda b: (b, 0)),
        compiler_params=pltpu.CompilerParams(
            dimension_semantics=("parallel",),      # batch steps independent -> shard across TCs
            vmem_limit_bytes=32 * 1024 * 1024,      # small working set; safe on v5e/v6e/v7x
        ),
    )(x, prepared["qkv_w"], prepared["proj_w"], prepared["proj_b"])
    # TODO(synk): with in_dim < 128 the output stores are 64-lane partial stores; a lane-dense
    #   (bt, N*in_dim) slab would need a minor-dim-merging reshape whose Mosaic support is
    #   shape-dependent, so it is deliberately left out at these shapes.
    return out2d.reshape(B, N, in_dim)


# ---------------------------------------------------------------------------
# pure-JAX reference (mirrors the PyTorch forward, f32) and parameter init
# ---------------------------------------------------------------------------
def _attention_reference(x, params, *, num_heads, qk_scale=None):
    B, N, C = x.shape
    in_dim = params["proj_w"].shape[0]
    hd = in_dim // num_heads
    scale = qk_scale if qk_scale is not None else (C // num_heads) ** -0.5
    qkv = x @ params["qkv_w"]
    qkv = qkv.reshape(B, N, 3, num_heads, hd).transpose(2, 0, 3, 1, 4)
    q, k, v = qkv[0], qkv[1], qkv[2]                          # (B, H, N, hd)
    attn = jax.nn.softmax((q * scale) @ jnp.swapaxes(k, -1, -2), axis=-1)
    y = (attn @ v).transpose(0, 2, 1, 3).reshape(B, N, in_dim)
    y = y @ params["proj_w"] + params["proj_b"]
    v_res = v.transpose(0, 2, 1, 3).reshape(B, N, in_dim)
    return v_res + y


def init_params(key, dim, in_dim, scale=0.02):
    # note: torch nn.Linear stores weight as (out, in); here weights are (in, out) == W.T
    k1, k2, k3 = jax.random.split(key, 3)
    return {
        "qkv_w": scale * jax.random.normal(k1, (dim, 3 * in_dim), jnp.float32),
        "proj_w": scale * jax.random.normal(k2, (in_dim, in_dim), jnp.float32),
        "proj_b": scale * jax.random.normal(k3, (1, in_dim), jnp.float32),
    }


if __name__ == "__main__":
    B, N, dim, in_dim, num_heads = 2, 16, 64, 64, 8
    key = jax.random.PRNGKey(0)
    kx, kp = jax.random.split(key)
    x = jax.random.normal(kx, (B, N, dim), jnp.float32)
    params = init_params(kp, dim, in_dim)

    prepared = prepare_params(params, dim=dim, num_heads=num_heads)   # one-time bf16 / scale fold
    fwd = jax.jit(functools.partial(attention_forward, num_heads=num_heads))
    out = fwd(x, prepared)
    jax.block_until_ready(out)

    ref = _attention_reference(x, params, num_heads=num_heads)
    assert out.shape == (B, N, in_dim)
    max_err = float(jnp.max(jnp.abs(out - ref)))
    assert max_err < 3e-2, f"max abs err vs reference: {max_err}"
    print("KERNEL_OK")
</pallas_src>

<mosaic_0001>
module attributes {stable_mosaic.version = 11 : i64} {
  func.func @_attention_kernel(%arg0: i32, %arg1: memref<1x16x64xf32, #tpu.memory_space<vmem>>, %arg2: memref<64x192xbf16, #tpu.memory_space<vmem>>, %arg3: memref<64x64xbf16, #tpu.memory_space<vmem>>, %arg4: memref<1x64xf32, #tpu.memory_space<vmem>>, %arg5: memref<16x64xf32, #tpu.memory_space<vmem>>) attributes {dimension_semantics = [#tpu.dimension_semantics<parallel>], iteration_bounds = array<i64: 2>, scalar_prefetch = 0 : i64, scratch_operands = 0 : i64, tpu.core_type = #tpu.core_type<tc>, window_params = [{transform_indices = @transform_0, window_bounds = array<i64: 1, 16, 64>}, {pipeline_mode = #tpu.pipeline_mode<synchronous>, transform_indices = @transform_1, window_bounds = array<i64: 64, 192>}, {pipeline_mode = #tpu.pipeline_mode<synchronous>, transform_indices = @transform_2, window_bounds = array<i64: 64, 64>}, {pipeline_mode = #tpu.pipeline_mode<synchronous>, transform_indices = @transform_3, window_bounds = array<i64: 1, 64>}, {transform_indices = @transform_4, window_bounds = array<i64: 16, 64>}]} {
    %c0 = arith.constant 0 : index
    %c0_0 = arith.constant 0 : index
    %c0_1 = arith.constant 0 : index
    %0 = vector.load %arg1[%c0, %c0_0, %c0_1] : memref<1x16x64xf32, #tpu.memory_space<vmem>>, vector<1x16x64xf32>
    %1 = vector.shape_cast %0 : vector<1x16x64xf32> to vector<16x64xf32>
    %2 = arith.truncf %1 : vector<16x64xf32> to vector<16x64xbf16>
    %c0_2 = arith.constant 0 : index
    %c0_3 = arith.constant 0 : index
    %3 = vector.load %arg2[%c0_2, %c0_3] : memref<64x192xbf16, #tpu.memory_space<vmem>>, vector<64x192xbf16>
    %cst = arith.constant dense<0.000000e+00> : vector<16x192xf32>
    %4 = tpu.matmul %2, %3, %cst {dimension_numbers = #tpu.dot_dimension_numbers<[1], [0], [0], [1], [0, 0, 1, 1], [], []>} : vector<16x64xbf16>, vector<64x192xbf16>, vector<16x192xf32> -> vector<16x192xf32>
    %5 = vector.extract_strided_slice %4 {offsets = [0, 0], sizes = [16, 64], strides = [1, 1]} : vector<16x192xf32> to vector<16x64xf32>
    %6 = vector.shape_cast %5 : vector<16x64xf32> to vector<1x16x64xf32>
    %7 = vector.extract_strided_slice %4 {offsets = [0, 64], sizes = [16, 64], strides = [1, 1]} : vector<16x192xf32> to vector<16x64xf32>
    %8 = vector.shape_cast %7 : vector<16x64xf32> to vector<1x16x64xf32>
    %9 = vector.extract_strided_slice %4 {offsets = [0, 128], sizes = [16, 64], strides = [1, 1]} : vector<16x192xf32> to vector<16x64xf32>
    %10 = vector.shape_cast %9 : vector<16x64xf32> to vector<1x16x64xf32>
    %11 = arith.truncf %10 : vector<1x16x64xf32> to vector<1x16x64xbf16>
    %12 = tpu.iota {dimensions = array<i32: 2>} : vector<1x16x64xi32>
    %cst_4 = arith.constant 0.000000e+00 : f32
    %13 = vector.broadcast %cst_4 : f32 to vector<1x16x64xf32>
    %14 = vector.extract_strided_slice %6 {offsets = [0, 0, 0], sizes = [1, 16, 8], strides = [1, 1, 1]} : vector<1x16x64xf32> to vector<1x16x8xf32>
    %15 = arith.truncf %14 : vector<1x16x8xf32> to vector<1x16x8xbf16>
    %16 = vector.extract_strided_slice %8 {offsets = [0, 0, 0], sizes = [1, 16, 8], strides = [1, 1, 1]} : vector<1x16x64xf32> to vector<1x16x8xf32>
    %17 = arith.truncf %16 : vector<1x16x8xf32> to vector<1x16x8xbf16>
    "tpu.trace_start"() <{level = 10 : i32, message = "bqd,bkd->bqk"}> : () -> ()
    %cst_5 = arith.constant dense<0.000000e+00> : vector<1x16x16xf32>
    %18 = tpu.matmul %15, %17, %cst_5 {dimension_numbers = #tpu.dot_dimension_numbers<[2], [2], [1], [1], [0, 0, 0, 1, 1, 1], [0], [0]>} : vector<1x16x8xbf16>, vector<1x16x8xbf16>, vector<1x16x16xf32> -> vector<1x16x16xf32>
    "tpu.trace_stop"() : () -> ()
    %cst_6 = arith.constant dense<0xFF800000> : vector<1x16xf32>
    %19 = vector.multi_reduction <maximumf>, %18, %cst_6 [2] : vector<1x16x16xf32> to vector<1x16xf32>
    %20 = vector.shape_cast %19 : vector<1x16xf32> to vector<1x16x1xf32>
    %21 = vector.broadcast %20 : vector<1x16x1xf32> to vector<1x16x16xf32>
    %22 = arith.subf %18, %21 : vector<1x16x16xf32>
    %23 = math.exp %22 : vector<1x16x16xf32>
    %cst_7 = arith.constant dense<0.000000e+00> : vector<1x16xf32>
    %24 = vector.multi_reduction <add>, %23, %cst_7 [2] : vector<1x16x16xf32> to vector<1x16xf32>
    %25 = vector.shape_cast %24 : vector<1x16xf32> to vector<1x16x1xf32>
    %26 = tpu.reciprocal %25 {approx = true} : vector<1x16x1xf32> -> vector<1x16x1xf32>
    %27 = vector.broadcast %26 : vector<1x16x1xf32> to vector<1x16x16xf32>
    %28 = arith.mulf %23, %27 : vector<1x16x16xf32>
    %29 = arith.truncf %28 : vector<1x16x16xf32> to vector<1x16x16xbf16>
    "tpu.trace_start"() <{level = 10 : i32, message = "bqk,bkd->bqd"}> : () -> ()
    %cst_8 = arith.constant dense<0.000000e+00> : vector<1x16x64xf32>
    %30 = tpu.matmul %29, %11, %cst_8 {dimension_numbers = #tpu.dot_dimension_numbers<[2], [1], [1], [2], [0, 0, 0, 1, 1, 2], [0], [0]>} : vector<1x16x16xbf16>, vector<1x16x64xbf16>, vector<1x16x64xf32> -> vector<1x16x64xf32>
    %c0_i32 = arith.constant 0 : i32
    "tpu.trace_stop"() : () -> ()
    %31 = vector.broadcast %c0_i32 : i32 to vector<1x16x64xi32>
    %32 = arith.cmpi sge, %12, %31 : vector<1x16x64xi32>
    %c8_i32 = arith.constant 8 : i32
    %33 = vector.broadcast %c8_i32 : i32 to vector<1x16x64xi32>
    %34 = arith.cmpi slt, %12, %33 : vector<1x16x64xi32>
    %35 = arith.andi %32, %34 : vector<1x16x64xi1>
    %36 = arith.select %35, %30, %13 : vector<1x16x64xi1>, vector<1x16x64xf32>
    %37 = vector.extract_strided_slice %6 {offsets = [0, 0, 8], sizes = [1, 16, 8], strides = [1, 1, 1]} : vector<1x16x64xf32> to vector<1x16x8xf32>
    %38 = arith.truncf %37 : vector<1x16x8xf32> to vector<1x16x8xbf16>
    %39 = vector.extract_strided_slice %8 {offsets = [0, 0, 8], sizes = [1, 16, 8], strides = [1, 1, 1]} : vector<1x16x64xf32> to vector<1x16x8xf32>
    %40 = arith.truncf %39 : vector<1x16x8xf32> to vector<1x16x8xbf16>
    "tpu.trace_start"() <{level = 10 : i32, message = "bqd,bkd->bqk"}> : () -> ()
    %cst_9 = arith.constant dense<0.000000e+00> : vector<1x16x16xf32>
    %41 = tpu.matmul %38, %40, %cst_9 {dimension_numbers = #tpu.dot_dimension_numbers<[2], [2], [1], [1], [0, 0, 0, 1, 1, 1], [0], [0]>} : vector<1x16x8xbf16>, vector<1x16x8xbf16>, vector<1x16x16xf32> -> vector<1x16x16xf32>
    "tpu.trace_stop"() : () -> ()
    %cst_10 = arith.constant dense<0xFF800000> : vector<1x16xf32>
    %42 = vector.multi_reduction <maximumf>, %41, %cst_10 [2] : vector<1x16x16xf32> to vector<1x16xf32>
    %43 = vector.shape_cast %42 : vector<1x16xf32> to vector<1x16x1xf32>
    %44 = vector.broadcast %43 : vector<1x16x1xf32> to vector<1x16x16xf32>
    %45 = arith.subf %41, %44 : vector<1x16x16xf32>
    %46 = math.exp %45 : vector<1x16x16xf32>
    %cst_11 = arith.constant dense<0.000000e+00> : vector<1x16xf32>
    %47 = vector.multi_reduction <add>, %46, %cst_11 [2] : vector<1x16x16xf32> to vector<1x16xf32>
    %48 = vector.shape_cast %47 : vector<1x16xf32> to vector<1x16x1xf32>
    %49 = tpu.reciprocal %48 {approx = true} : vector<1x16x1xf32> -> vector<1x16x1xf32>
    %50 = vector.broadcast %49 : vector<1x16x1xf32> to vector<1x16x16xf32>
    %51 = arith.mulf %46, %50 : vector<1x16x16xf32>
    %52 = arith.truncf %51 : vector<1x16x16xf32> to vector<1x16x16xbf16>
    "tpu.trace_start"() <{level = 10 : i32, message = "bqk,bkd->bqd"}> : () -> ()
    %cst_12 = arith.constant dense<0.000000e+00> : vector<1x16x64xf32>
    %53 = tpu.matmul %52, %11, %cst_12 {dimension_numbers = #tpu.dot_dimension_numbers<[2], [1], [1], [2], [0, 0, 0, 1, 1, 2], [0], [0]>} : vector<1x16x16xbf16>, vector<1x16x64xbf16>, vector<1x16x64xf32> -> vector<1x16x64xf32>
    %c8_i32_13 = arith.constant 8 : i32
    "tpu.trace_stop"() : () -> ()
    %54 = vector.broadcast %c8_i32_13 : i32 to vector<1x16x64xi32>
    %55 = arith.cmpi sge, %12, %54 : vector<1x16x64xi32>
    %c16_i32 = arith.constant 16 : i32
    %56 = vector.broadcast %c16_i32 : i32 to vector<1x16x64xi32>
    %57 = arith.cmpi slt, %12, %56 : vector<1x16x64xi32>
    %58 = arith.andi %55, %57 : vector<1x16x64xi1>
    %59 = arith.select %58, %53, %36 : vector<1x16x64xi1>, vector<1x16x64xf32>
    %60 = vector.extract_strided_slice %6 {offsets = [0, 0, 16], sizes = [1, 16, 8], strides = [1, 1, 1]} : vector<1x16x64xf32> to vector<1x16x8xf32>
    %61 = arith.truncf %60 : vector<1x16x8xf32> to vector<1x16x8xbf16>
    %62 = vector.extract_strided_slice %8 {offsets = [0, 0, 16], sizes = [1, 16, 8], strides = [1, 1, 1]} : vector<1x16x64xf32> to vector<1x16x8xf32>
    %63 = arith.truncf %62 : vector<1x16x8xf32> to vector<1x16x8xbf16>
    "tpu.trace_start"() <{level = 10 : i32, message = "bqd,bkd->bqk"}> : () -> ()
    %cst_14 = arith.constant dense<0.000000e+00> : vector<1x16x16xf32>
    %64 = tpu.matmul %61, %63, %cst_14 {dimension_numbers = #tpu.dot_dimension_numbers<[2], [2], [1], [1], [0, 0, 0, 1, 1, 1], [0], [0]>} : vector<1x16x8xbf16>, vector<1x16x8xbf16>, vector<1x16x16xf32> -> vector<1x16x16xf32>
    "tpu.trace_stop"() : () -> ()
    %cst_15 = arith.constant dense<0xFF800000> : vector<1x16xf32>
    %65 = vector.multi_reduction <maximumf>, %64, %cst_15 [2] : vector<1x16x16xf32> to vector<1x16xf32>
    %66 = vector.shape_cast %65 : vector<1x16xf32> to vector<1x16x1xf32>
    %67 = vector.broadcast %66 : vector<1x16x1xf32> to vector<1x16x16xf32>
    %68 = arith.subf %64, %67 : vector<1x16x16xf32>
    %69 = math.exp %68 : vector<1x16x16xf32>
    %cst_16 = arith.constant dense<0.000000e+00> : vector<1x16xf32>
    %70 = vector.multi_reduction <add>, %69, %cst_16 [2] : vector<1x16x16xf32> to vector<1x16xf32>
    %71 = vector.shape_cast %70 : vector<1x16xf32> to vector<1x16x1xf32>
    %72 = tpu.reciprocal %71 {approx = true} : vector<1x16x1xf32> -> vector<1x16x1xf32>
    %73 = vector.broadcast %72 : vector<1x16x1xf32> to vector<1x16x16xf32>
    %74 = arith.mulf %69, %73 : vector<1x16x16xf32>
    %75 = arith.truncf %74 : vector<1x16x16xf32> to vector<1x16x16xbf16>
    "tpu.trace_start"() <{level = 10 : i32, message = "bqk,bkd->bqd"}> : () -> ()
    %cst_17 = arith.constant dense<0.000000e+00> : vector<1x16x64xf32>
    %76 = tpu.matmul %75, %11, %cst_17 {dimension_numbers = #tpu.dot_dimension_numbers<[2], [1], [1], [2], [0, 0, 0, 1, 1, 2], [0], [0]>} : vector<1x16x16xbf16>, vector<1x16x64xbf16>, vector<1x16x64xf32> -> vector<1x16x64xf32>
    %c16_i32_18 = arith.constant 16 : i32
    "tpu.trace_stop"() : () -> ()
    %77 = vector.broadcast %c16_i32_18 : i32 to vector<1x16x64xi32>
    %78 = arith.cmpi sge, %12, %77 : vector<1x16x64xi32>
    %c24_i32 = arith.constant 24 : i32
    %79 = vector.broadcast %c24_i32 : i32 to vector<1x16x64xi32>
    %80 = arith.cmpi slt, %12, %79 : vector<1x16x64xi32>
    %81 = arith.andi %78, %80 : vector<1x16x64xi1>
    %82 = arith.select %81, %76, %59 : vector<1x16x64xi1>, vector<1x16x64xf32>
    %83 = vector.extract_strided_slice %6 {offsets = [0, 0, 24], sizes = [1, 16, 8], strides = [1, 1, 1]} : vector<1x16x64xf32> to vector<1x16x8xf32>
    %84 = arith.truncf %83 : vector<1x16x8xf32> to vector<1x16x8xbf16>
    %85 = vector.extract_strided_slice %8 {offsets = [0, 0, 24], sizes = [1, 16, 8], strides = [1, 1, 1]} : vector<1x16x64xf32> to vector<1x16x8xf32>
    %86 = arith.truncf %85 : vector<1x16x8xf32> to vector<1x16x8xbf16>
    "tpu.trace_start"() <{level = 10 : i32, message = "bqd,bkd->bqk"}> : () -> ()
    %cst_19 = arith.constant dense<0.000000e+00> : vector<1x16x16xf32>
    %87 = tpu.matmul %84, %86, %cst_19 {dimension_numbers = #tpu.dot_dimension_numbers<[2], [2], [1], [1], [0, 0, 0, 1, 1, 1], [0], [0]>} : vector<1x16x8xbf16>, vector<1x16x8xbf16>, vector<1x16x16xf32> -> vector<1x16x16xf32>
    "tpu.trace_stop"() : () -> ()
    %cst_20 = arith.constant dense<0xFF800000> : vector<1x16xf32>
    %88 = vector.multi_reduction <maximumf>, %87, %cst_20 [2] : vector<1x16x16xf32> to vector<1x16xf32>
    %89 = vector.shape_cast %88 : vector<1x16xf32> to vector<1x16x1xf32>
    %90 = vector.broadcast %89 : vector<1x16x1xf32> to vector<1x16x16xf32>
    %91 = arith.subf %87, %90 : vector<1x16x16xf32>
    %92 = math.exp %91 : vector<1x16x16xf32>
    %cst_21 = arith.constant dense<0.000000e+00> : vector<1x16xf32>
    %93 = vector.multi_reduction <add>, %92, %cst_21 [2] : vector<1x16x16xf32> to vector<1x16xf32>
    %94 = vector.shape_cast %93 : vector<1x16xf32> to vector<1x16x1xf32>
    %95 = tpu.reciprocal %94 {approx = true} : vector<1x16x1xf32> -> vector<1x16x1xf32>
    %96 = vector.broadcast %95 : vector<1x16x1xf32> to vector<1x16x16xf32>
    %97 = arith.mulf %92, %96 : vector<1x16x16xf32>
    %98 = arith.truncf %97 : vector<1x16x16xf32> to vector<1x16x16xbf16>
    "tpu.trace_start"() <{level = 10 : i32, message = "bqk,bkd->bqd"}> : () -> ()
    %cst_22 = arith.constant dense<0.000000e+00> : vector<1x16x64xf32>
    %99 = tpu.matmul %98, %11, %cst_22 {dimension_numbers = #tpu.dot_dimension_numbers<[2], [1], [1], [2], [0, 0, 0, 1, 1, 2], [0], [0]>} : vector<1x16x16xbf16>, vector<1x16x64xbf16>, vector<1x16x64xf32> -> vector<1x16x64xf32>
    %c24_i32_23 = arith.constant 24 : i32
    "tpu.trace_stop"() : () -> ()
    %100 = vector.broadcast %c24_i32_23 : i32 to vector<1x16x64xi32>
    %101 = arith.cmpi sge, %12, %100 : vector<1x16x64xi32>
    %c32_i32 = arith.constant 32 : i32
    %102 = vector.broadcast %c32_i32 : i32 to vector<1x16x64xi32>
    %103 = arith.cmpi slt, %12, %102 : vector<1x16x64xi32>
    %104 = arith.andi %101, %103 : vector<1x16x64xi1>
    %105 = arith.select %104, %99, %82 : vector<1x16x64xi1>, vector<1x16x64xf32>
    %106 = vector.extract_strided_slice %6 {offsets = [0, 0, 32], sizes = [1, 16, 8], strides = [1, 1, 1]} : vector<1x16x64xf32> to vector<1x16x8xf32>
    %107 = arith.truncf %106 : vector<1x16x8xf32> to vector<1x16x8xbf16>
    %108 = vector.extract_strided_slice %8 {offsets = [0, 0, 32], sizes = [1, 16, 8], strides = [1, 1, 1]} : vector<1x16x64xf32> to vector<1x16x8xf32>
    %109 = arith.truncf %108 : vector<1x16x8xf32> to vector<1x16x8xbf16>
    "tpu.trace_start"() <{level = 10 : i32, message = "bqd,bkd->bqk"}> : () -> ()
    %cst_24 = arith.constant dense<0.000000e+00> : vector<1x16x16xf32>
    %110 = tpu.matmul %107, %109, %cst_24 {dimension_numbers = #tpu.dot_dimension_numbers<[2], [2], [1], [1], [0, 0, 0, 1, 1, 1], [0], [0]>} : vector<1x16x8xbf16>, vector<1x16x8xbf16>, vector<1x16x16xf32> -> vector<1x16x16xf32>
    "tpu.trace_stop"() : () -> ()
    %cst_25 = arith.constant dense<0xFF800000> : vector<1x16xf32>
    %111 = vector.multi_reduction <maximumf>, %110, %cst_25 [2] : vector<1x16x16xf32> to vector<1x16xf32>
    %112 = vector.shape_cast %111 : vector<1x16xf32> to vector<1x16x1xf32>
    %113 = vector.broadcast %112 : vector<1x16x1xf32> to vector<1x16x16xf32>
    %114 = arith.subf %110, %113 : vector<1x16x16xf32>
    %115 = math.exp %114 : vector<1x16x16xf32>
    %cst_26 = arith.constant dense<0.000000e+00> : vector<1x16xf32>
    %116 = vector.multi_reduction <add>, %115, %cst_26 [2] : vector<1x16x16xf32> to vector<1x16xf32>
    %117 = vector.shape_cast %116 : vector<1x16xf32> to vector<1x16x1xf32>
    %118 = tpu.reciprocal %117 {approx = true} : vector<1x16x1xf32> -> vector<1x16x1xf32>
    %119 = vector.broadcast %118 : vector<1x16x1xf32> to vector<1x16x16xf32>
    %120 = arith.mulf %115, %119 : vector<1x16x16xf32>
    %121 = arith.truncf %120 : vector<1x16x16xf32> to vector<1x16x16xbf16>
    "tpu.trace_start"() <{level = 10 : i32, message = "bqk,bkd->bqd"}> : () -> ()
    %cst_27 = arith.constant dense<0.000000e+00> : vector<1x16x64xf32>
    %122 = tpu.matmul %121, %11, %cst_27 {dimension_numbers = #tpu.dot_dimension_numbers<[2], [1], [1], [2], [0, 0, 0, 1, 1, 2], [0], [0]>} : vector<1x16x16xbf16>, vector<1x16x64xbf16>, vector<1x16x64xf32> -> vector<1x16x64xf32>
    %c32_i32_28 = arith.constant 32 : i32
    "tpu.trace_stop"() : () -> ()
    %123 = vector.broadcast %c32_i32_28 : i32 to vector<1x16x64xi32>
    %124 = arith.cmpi sge, %12, %123 : vector<1x16x64xi32>
    %c40_i32 = arith.constant 40 : i32
    %125 = vector.broadcast %c40_i32 : i32 to vector<1x16x64xi32>
    %126 = arith.cmpi slt, %12, %125 : vector<1x16x64xi32>
    %127 = arith.andi %124, %126 : vector<1x16x64xi1>
    %128 = arith.select %127, %122, %105 : vector<1x16x64xi1>, vector<1x16x64xf32>
    %129 = vector.extract_strided_slice %6 {offsets = [0, 0, 40], sizes = [1, 16, 8], strides = [1, 1, 1]} : vector<1x16x64xf32> to vector<1x16x8xf32>
    %130 = arith.truncf %129 : vector<1x16x8xf32> to vector<1x16x8xbf16>
    %131 = vector.extract_strided_slice %8 {offsets = [0, 0, 40], sizes = [1, 16, 8], strides = [1, 1, 1]} : vector<1x16x64xf32> to vector<1x16x8xf32>
    %132 = arith.truncf %131 : vector<1x16x8xf32> to vector<1x16x8xbf16>
    "tpu.trace_start"() <{level = 10 : i32, message = "bqd,bkd->bqk"}> : () -> ()
    %cst_29 = arith.constant dense<0.000000e+00> : vector<1x16x16xf32>
    %133 = tpu.matmul %130, %132, %cst_29 {dimension_numbers = #tpu.dot_dimension_numbers<[2], [2], [1], [1], [0, 0, 0, 1, 1, 1], [0], [0]>} : vector<1x16x8xbf16>, vector<1x16x8xbf16>, vector<1x16x16xf32> -> vector<1x16x16xf32>
    "tpu.trace_stop"() : () -> ()
    %cst_30 = arith.constant dense<0xFF800000> : vector<1x16xf32>
    %134 = vector.multi_reduction <maximumf>, %133, %cst_30 [2] : vector<1x16x16xf32> to vector<1x16xf32>
    %135 = vector.shape_cast %134 : vector<1x16xf32> to vector<1x16x1xf32>
    %136 = vector.broadcast %135 : vector<1x16x1xf32> to vector<1x16x16xf32>
    %137 = arith.subf %133, %136 : vector<1x16x16xf32>
    %138 = math.exp %137 : vector<1x16x16xf32>
    %cst_31 = arith.constant dense<0.000000e+00> : vector<1x16xf32>
    %139 = vector.multi_reduction <add>, %138, %cst_31 [2] : vector<1x16x16xf32> to vector<1x16xf32>
    %140 = vector.shape_cast %139 : vector<1x16xf32> to vector<1x16x1xf32>
    %141 = tpu.reciprocal %140 {approx = true} : vector<1x16x1xf32> -> vector<1x16x1xf32>
    %142 = vector.broadcast %141 : vector<1x16x1xf32> to vector<1x16x16xf32>
    %143 = arith.mulf %138, %142 : vector<1x16x16xf32>
    %144 = arith.truncf %143 : vector<1x16x16xf32> to vector<1x16x16xbf16>
    "tpu.trace_start"() <{level = 10 : i32, message = "bqk,bkd->bqd"}> : () -> ()
    %cst_32 = arith.constant dense<0.000000e+00> : vector<1x16x64xf32>
    %145 = tpu.matmul %144, %11, %cst_32 {dimension_numbers = #tpu.dot_dimension_numbers<[2], [1], [1], [2], [0, 0, 0, 1, 1, 2], [0], [0]>} : vector<1x16x16xbf16>, vector<1x16x64xbf16>, vector<1x16x64xf32> -> vector<1x16x64xf32>
    %c40_i32_33 = arith.constant 40 : i32
    "tpu.trace_stop"() : () -> ()
    %146 = vector.broadcast %c40_i32_33 : i32 to vector<1x16x64xi32>
    %147 = arith.cmpi sge, %12, %146 : vector<1x16x64xi32>
    %c48_i32 = arith.constant 48 : i32
    %148 = vector.broadcast %c48_i32 : i32 to vector<1x16x64xi32>
    %149 = arith.cmpi slt, %12, %148 : vector<1x16x64xi32>
    %150 = arith.andi %147, %149 : vector<1x16x64xi1>
    %151 = arith.select %150, %145, %128 : vector<1x16x64xi1>, vector<1x16x64xf32>
    %152 = vector.extract_strided_slice %6 {offsets = [0, 0, 48], sizes = [1, 16, 8], strides = [1, 1, 1]} : vector<1x16x64xf32> to vector<1x16x8xf32>
    %153 = arith.truncf %152 : vector<1x16x8xf32> to vector<1x16x8xbf16>
    %154 = vector.extract_strided_slice %8 {offsets = [0, 0, 48], sizes = [1, 16, 8], strides = [1, 1, 1]} : vector<1x16x64xf32> to vector<1x16x8xf32>
    %155 = arith.truncf %154 : vector<1x16x8xf32> to vector<1x16x8xbf16>
    "tpu.trace_start"() <{level = 10 : i32, message = "bqd,bkd->bqk"}> : () -> ()
    %cst_34 = arith.constant dense<0.000000e+00> : vector<1x16x16xf32>
    %156 = tpu.matmul %153, %155, %cst_34 {dimension_numbers = #tpu.dot_dimension_numbers<[2], [2], [1], [1], [0, 0, 0, 1, 1, 1], [0], [0]>} : vector<1x16x8xbf16>, vector<1x16x8xbf16>, vector<1x16x16xf32> -> vector<1x16x16xf32>
    "tpu.trace_stop"() : () -> ()
    %cst_35 = arith.constant dense<0xFF800000> : vector<1x16xf32>
    %157 = vector.multi_reduction <maximumf>, %156, %cst_35 [2] : vector<1x16x16xf32> to vector<1x16xf32>
    %158 = vector.shape_cast %157 : vector<1x16xf32> to vector<1x16x1xf32>
    %159 = vector.broadcast %158 : vector<1x16x1xf32> to vector<1x16x16xf32>
    %160 = arith.subf %156, %159 : vector<1x16x16xf32>
    %161 = math.exp %160 : vector<1x16x16xf32>
    %cst_36 = arith.constant dense<0.000000e+00> : vector<1x16xf32>
    %162 = vector.multi_reduction <add>, %161, %cst_36 [2] : vector<1x16x16xf32> to vector<1x16xf32>
    %163 = vector.shape_cast %162 : vector<1x16xf32> to vector<1x16x1xf32>
    %164 = tpu.reciprocal %163 {approx = true} : vector<1x16x1xf32> -> vector<1x16x1xf32>
    %165 = vector.broadcast %164 : vector<1x16x1xf32> to vector<1x16x16xf32>
    %166 = arith.mulf %161, %165 : vector<1x16x16xf32>
    %167 = arith.truncf %166 : vector<1x16x16xf32> to vector<1x16x16xbf16>
    "tpu.trace_start"() <{level = 10 : i32, message = "bqk,bkd->bqd"}> : () -> ()
    %cst_37 = arith.constant dense<0.000000e+00> : vector<1x16x64xf32>
    %168 = tpu.matmul %167, %11, %cst_37 {dimension_numbers = #tpu.dot_dimension_numbers<[2], [1], [1], [2], [0, 0, 0, 1, 1, 2], [0], [0]>} : vector<1x16x16xbf16>, vector<1x16x64xbf16>, vector<1x16x64xf32> -> vector<1x16x64xf32>
    %c48_i32_38 = arith.constant 48 : i32
    "tpu.trace_stop"() : () -> ()
    %169 = vector.broadcast %c48_i32_38 : i32 to vector<1x16x64xi32>
    %170 = arith.cmpi sge, %12, %169 : vector<1x16x64xi32>
    %c56_i32 = arith.constant 56 : i32
    %171 = vector.broadcast %c56_i32 : i32 to vector<1x16x64xi32>
    %172 = arith.cmpi slt, %12, %171 : vector<1x16x64xi32>
    %173 = arith.andi %170, %172 : vector<1x16x64xi1>
    %174 = arith.select %173, %168, %151 : vector<1x16x64xi1>, vector<1x16x64xf32>
    %175 = vector.extract_strided_slice %6 {offsets = [0, 0, 56], sizes = [1, 16, 8], strides = [1, 1, 1]} : vector<1x16x64xf32> to vector<1x16x8xf32>
    %176 = arith.truncf %175 : vector<1x16x8xf32> to vector<1x16x8xbf16>
    %177 = vector.extract_strided_slice %8 {offsets = [0, 0, 56], sizes = [1, 16, 8], strides = [1, 1, 1]} : vector<1x16x64xf32> to vector<1x16x8xf32>
    %178 = arith.truncf %177 : vector<1x16x8xf32> to vector<1x16x8xbf16>
    "tpu.trace_start"() <{level = 10 : i32, message = "bqd,bkd->bqk"}> : () -> ()
    %cst_39 = arith.constant dense<0.000000e+00> : vector<1x16x16xf32>
    %179 = tpu.matmul %176, %178, %cst_39 {dimension_numbers = #tpu.dot_dimension_numbers<[2], [2], [1], [1], [0, 0, 0, 1, 1, 1], [0], [0]>} : vector<1x16x8xbf16>, vector<1x16x8xbf16>, vector<1x16x16xf32> -> vector<1x16x16xf32>
    "tpu.trace_stop"() : () -> ()
    %cst_40 = arith.constant dense<0xFF800000> : vector<1x16xf32>
    %180 = vector.multi_reduction <maximumf>, %179, %cst_40 [2] : vector<1x16x16xf32> to vector<1x16xf32>
    %181 = vector.shape_cast %180 : vector<1x16xf32> to vector<1x16x1xf32>
    %182 = vector.broadcast %181 : vector<1x16x1xf32> to vector<1x16x16xf32>
    %183 = arith.subf %179, %182 : vector<1x16x16xf32>
    %184 = math.exp %183 : vector<1x16x16xf32>
    %cst_41 = arith.constant dense<0.000000e+00> : vector<1x16xf32>
    %185 = vector.multi_reduction <add>, %184, %cst_41 [2] : vector<1x16x16xf32> to vector<1x16xf32>
    %186 = vector.shape_cast %185 : vector<1x16xf32> to vector<1x16x1xf32>
    %187 = tpu.reciprocal %186 {approx = true} : vector<1x16x1xf32> -> vector<1x16x1xf32>
    %188 = vector.broadcast %187 : vector<1x16x1xf32> to vector<1x16x16xf32>
    %189 = arith.mulf %184, %188 : vector<1x16x16xf32>
    %190 = arith.truncf %189 : vector<1x16x16xf32> to vector<1x16x16xbf16>
    "tpu.trace_start"() <{level = 10 : i32, message = "bqk,bkd->bqd"}> : () -> ()
    %cst_42 = arith.constant dense<0.000000e+00> : vector<1x16x64xf32>
    %191 = tpu.matmul %190, %11, %cst_42 {dimension_numbers = #tpu.dot_dimension_numbers<[2], [1], [1], [2], [0, 0, 0, 1, 1, 2], [0], [0]>} : vector<1x16x16xbf16>, vector<1x16x64xbf16>, vector<1x16x64xf32> -> vector<1x16x64xf32>
    %c56_i32_43 = arith.constant 56 : i32
    "tpu.trace_stop"() : () -> ()
    %192 = vector.broadcast %c56_i32_43 : i32 to vector<1x16x64xi32>
    %193 = arith.cmpi sge, %12, %192 : vector<1x16x64xi32>
    %c64_i32 = arith.constant 64 : i32
    %194 = vector.broadcast %c64_i32 : i32 to vector<1x16x64xi32>
    %195 = arith.cmpi slt, %12, %194 : vector<1x16x64xi32>
    %196 = arith.andi %193, %195 : vector<1x16x64xi1>
    %197 = arith.select %196, %191, %174 : vector<1x16x64xi1>, vector<1x16x64xf32>
    %198 = vector.shape_cast %197 : vector<1x16x64xf32> to vector<16x64xf32>
    %199 = arith.truncf %198 : vector<16x64xf32> to vector<16x64xbf16>
    %c0_44 = arith.constant 0 : index
    %c0_45 = arith.constant 0 : index
    %200 = vector.load %arg3[%c0_44, %c0_45] : memref<64x64xbf16, #tpu.memory_space<vmem>>, vector<64x64xbf16>
    %cst_46 = arith.constant dense<0.000000e+00> : vector<16x64xf32>
    %201 = tpu.matmul %199, %200, %cst_46 {dimension_numbers = #tpu.dot_dimension_numbers<[1], [0], [0], [1], [0, 0, 1, 1], [], []>} : vector<16x64xbf16>, vector<64x64xbf16>, vector<16x64xf32> -> vector<16x64xf32>
    %202 = arith.addf %9, %201 : vector<16x64xf32>
    %c0_47 = arith.constant 0 : index
    %c0_48 = arith.constant 0 : index
    %203 = vector.load %arg4[%c0_47, %c0_48] : memref<1x64xf32, #tpu.memory_space<vmem>>, vector<1x64xf32>
    %204 = vector.broadcast %203 : vector<1x64xf32> to vector<16x64xf32>
    %205 = arith.addf %202, %204 : vector<16x64xf32>
    %c0_49 = arith.constant 0 : index
    %c0_50 = arith.constant 0 : index
    %206 = vector.load %arg5[%c0_49, %c0_50] : memref<16x64xf32, #tpu.memory_space<vmem>>, vector<16x64xf32>
    tpu.vector_store %arg5[%c0_49, %c0_50], %205 {strides = array<i32>} : memref<16x64xf32, #tpu.memory_space<vmem>>, vector<16x64xf32>,
    return
  }
  func.func @transform_0(%arg0: i32) -> (i32, i32, i32) {
    %c0_i32 = arith.constant 0 : i32
    %c0_i32_0 = arith.constant 0 : i32
    %c0_i32_1 = arith.constant 0 : i32
    return %arg0, %c0_i32, %c0_i32_0 : i32, i32, i32
  }
  func.func @transform_1(%arg0: i32) -> (i32, i32) {
    %c0_i32 = arith.constant 0 : i32
    %c0_i32_0 = arith.constant 0 : i32
    %c0_i32_1 = arith.constant 0 : i32
    return %c0_i32, %c0_i32_0 : i32, i32
  }
  func.func @transform_2(%arg0: i32) -> (i32, i32) {
    %c0_i32 = arith.constant 0 : i32
    %c0_i32_0 = arith.constant 0 : i32
    %c0_i32_1 = arith.constant 0 : i32
    return %c0_i32, %c0_i32_0 : i32, i32
  }
  func.func @transform_3(%arg0: i32) -> (i32, i32) {
    %c0_i32 = arith.constant 0 : i32
    %c0_i32_0 = arith.constant 0 : i32
    %c0_i32_1 = arith.constant 0 : i32
    return %c0_i32, %c0_i32_0 : i32, i32
  }
  func.func @transform_4(%arg0: i32) -> (i32, i32) {
    %c0_i32 = arith.constant 0 : i32
    %c0_i32_0 = arith.constant 0 : i32
    return %arg0, %c0_i32 : i32, i32
  }
}

</mosaic_0001>

<bundles_post_ra>
// kernel: attention_forward.1
= control target key start
LH: loop header
LB: loop body
LE: loop exit
PB: predicated region body
PF: predicated region fallthrough
CT: control target
= control target key end

     0   :  { %9 = vsyncpa [#allocation3], 0  ;;  %s2054_s0 = inlined_call_operand.hbm [shape: f32[2,16,64], index: 0, kind: input, shape index: {}]   ;;  %s2055_s1 = inlined_call_operand.hbm [shape: bf16[64,192], index: 1, kind: input, shape index: {}]   ;;  %s2056_s2 = inlined_call_operand.hbm [shape: bf16[64,64], index: 2, kind: input, shape index: {}]   ;;  %s2057_s3 = inlined_call_operand.hbm [shape: f32[1,64], index: 3, kind: input, shape index: {}]   ;;  %s2058_s4 = inlined_call_operand.hbm [shape: f32[32,64], index: 4, kind: output, shape index: {}]  }
   0x1   :  { %11 = vsyncpa [#allocation3 + $0x1], 0 }
   0x2   :  { %12 = vsyncpa [#allocation6], 0 }
   0x3   :  { %13 = vsyncpa [#allocation9], 0 }
   0x4   :  { %14 = vsyncpa [#allocation4], 0 }
   0x5   :  { %16 = vsyncpa [#allocation4 + $0x1], 0  ;;  %s1653_s15 = smov 0   ;;  %s1655_s16 = smov 0  }
   0x6   :  { %s1657_s17 = smov 0   ;;  %s1659_s18 = smov 0  }
   0x7 LB: > { %s1674_s19 = sadd.s32 4294967295, %s1603_s18   ;;  %s1146_s20 = sadd.s32 4294967294, %s1603_s18   ;;  %s1603_s18 = sphi %s1659_s18, %s2077_s18   ;;  %s1599_s17 = sphi %s1657_s17, %s2076_s17   ;;  %s1595_s16 = sphi %s1655_s16, %s2075_s16   ;;  %s1591_s15 = sphi %s1653_s15, %s2074_s15  }
   0x8   : > { %p42_p0 = scmp.ne.s32.totalorder %s1595_s16, %s1591_s15  ;;  %p43_p1 = scmp.eq.s32.totalorder %s1674_s19, 0 }
   0x9   : > { %p129_p2 = scmp.eq.s32.totalorder %s1674_s19, 1  ;;  %p135_p3 = scmp.eq.s32.totalorder %s1146_s20, 1 }
   0xa   : > { %p1683_p4 = por %p43_p1, %p42_p0  ;;  %p1147_p5 = scmp.ge.s32.totalorder %s1603_s18, 1 }
   0xb   : > { %p1688_p6 = por %p135_p3, %p42_p0  ;;  %p142_p7 = scmp.lt.s32.totalorder %s1603_s18, 3 }
   0xc   : > { %s153_s25 = sshll.u32 %s2055_s1, 4  ;;  %s1605_s27 = smov [#allocation5]   ;;  %s154_s25 = int_to_ptr.hbm [resolvable:$true] %s153_s25 }
   0xd   : > { %p1696_p8 = pnand %p1147_p5, %p142_p7  ;;  %s155_s28 = sshll.u32 %s1605_s27, 4  ;;  %s156_s28 = int_to_ptr.vmem [resolvable:$true] %s155_s28 }
   0xe   : > { %s167_s6 = sshll.u32 %s2056_s2, 4  ;;  %s1606_s7 = smov 128   ;;  %s168_s6 = int_to_ptr.hbm [resolvable:$true] %s167_s6 }
   0xf   : > { %p1263_p9 = pneg %p1696_p8  ;;  %s1607_s8 = smov 8  }
  0x10   : > { %s1608_s9 = smov [#allocation7]   ;;  %s1609_s11 = smov 64  }
  0x11   : > { %p1704_p10 = pnand %p1263_p9, %p43_p1  ;;  %s169_s10 = sshll.u32 %s1608_s9, 4  ;;  %s170_s10 = int_to_ptr.vmem [resolvable:$true] %s169_s10 }
  0x12   : > { %s1610_s12 = smov 4   ;;  %s182_s20 = sshll.u32 %s2057_s3, 4  ;;  %s183_s20 = int_to_ptr.hbm [resolvable:$true] %s182_s20 }
  0x13   : > { %1266 = dma.hbm_to_vmem [thread:$0]  (!%p1704_p10), %s154_s25, 1024, %s156_s28, [#allocation6], %s1606_s7, %s1606_s7, %s1607_s8  }
  0x14   : > { %1269 = dma.hbm_to_vmem [thread:$0]  (!%p1704_p10), %s168_s6, 512, %s170_s10, [#allocation6], %s1609_s11, %s1609_s11, %s1610_s12  }
  0x15   : > { %s1611_s23 = smov [#allocation8]   ;;  %s1725_s25 = sadd.s32 1, %s1603_s18  }
  0x16   : > { %s184_s24 = sshll.u32 %s1611_s23, 4  ;;  %s26_s27 = ssub.s32 %s1603_s18, %s1725_s25  ;;  %s185_s24 = int_to_ptr.vmem [resolvable:$true] %s184_s24 }
  0x17   : > { %1272 = dma.hbm_to_vmem [thread:$0]  (!%p1704_p10), %s183_s20, 16, %s185_s24, [#allocation9]  }
  0x18   : > { %s29_s28 = sadd.s32 1, %s1599_s17  ;;  %p27_p12 = scmp.eq.s32.totalorder %s26_s27, 0 }
  0x19   : > { %p36_p13 = scmp.ne.s32.totalorder %s1599_s17, %s1595_s16  ;;  %p37_p0 = scmp.eq.s32.totalorder %s1603_s18, 0 }
  0x1a   : > { %s1734_s30 = scalar_select %p27_p12, %s1599_s17, %s29_s28  }
  0x1b   : > { %p1738_p3 = por %p129_p2, %p36_p13  ;;  %p1284_p5 = scmp.lt.s32.totalorder %s1603_s18, 2 }
  0x1c   : > { %s195_s6 = sand.u32 1, %s1599_s17   ;;  %s1233_s9 = sshll.u32 %s1603_s18, 4 }
  0x1d   : > { %p38_p7 = por %p37_p0, %p36_p13  ;;  %s1152_s29 = sshll.u32 %s195_s6, 4 }
  0x1e   : > { %s204_s12 = scalar_lea.hbm %s2054_s0, %s1233_s9  ;;  %s199_s14 = scalar_lea.vmem [#allocation2], %s1152_s29 }
  0x1f   : > { %s205_s13 = sshll.u32 %s204_s12, 4  ;;  %s207_s20 = sshll.u32 %s199_s14, 4  ;;  %s206_s13 = int_to_ptr.hbm [resolvable:$true] %s205_s13  ;;  %s208_s20 = int_to_ptr.vmem [resolvable:$true] %s207_s20 }
  0x20   : > { %p1748_p9 = pnand %p1284_p5, %p38_p7  ;;  %s196_s24 = scalar_lea.sflag [#allocation3], %s195_s6 }
  0x21   : > { %s1499_s27 = sshra.s32 %s206_s13, 4  ;;  %s1506_s29 = scalar_lea.hbm %s2054_s0, 32  ;;  %s1500_s27 = int_to_ptr.hbm [resolvable:$true] %s1499_s27 }
  0x22   : > { %s1501_s28 = scalar_lea.hbm %s1500_s27, 16  ;;  %p1503_p10 = pneg %p1748_p9 }
  0x23   : > { %p1502_p2 = scmp.ne.s32.totalorder %s1500_s27, %s1501_s28  ;;  %p1507_p0 = scmp.lt.s32.totalorder %s1500_s27, %s2054_s0 }
  0x24   : > { %p1508_p5 = scmp.lt.s32.totalorder %s1506_s29, %s1501_s28 }
  0x25   : > { %p1504_p12 = pnand %p1503_p10, %p1502_p2 }
  0x26   : > { %p1509_p7 = por %p1508_p5, %p1507_p0 }
  0x27   : > { %p1505_p13 = pneg %p1504_p12 }
  0x29   : > { %p1510_p11 = pnand %p1509_p7, %p1505_p13 }
  0x2b   : > { %1513 = shalt.err (!%p1510_p11)
}
  0x2c   : > { %1276 = dma.hbm_to_vmem [thread:$0]  (!%p1748_p9), %s206_s13, 256, %s208_s20, %s196_s24, %s1606_s7, %s1606_s7, %s1607_s8  }
  0x2d   : > { %219 = sbr.rel (%p1696_p8) target bundleno = 1560 (0x618), region = 36  ;;  %s1768_s6 = sand.u32 (!%p1696_p8), 1, %s1595_s16  }
  0x2e   : > { %s1156_s14 = sshll.u32 (!%p1696_p8), %s1768_s6, 4  ;;  %s222_s27 = scalar_lea.sflag (!%p1696_p8), [#allocation3], %s1768_s6 }
  0x2f   : > { %s1774_s28 = scalar_lea.vmem (!%p1696_p8), [#allocation2], %s1156_s14 }
  0x32   : > { %1574 = dma.done.wait (%p1683_p4), %s222_s27, 256  }
  0x33   : > { %1576 = vsyncadd (%p1683_p4), %s222_s27, 4294967040 }
  0x34   : > { %1578 = dma.done.wait (%p43_p1), [#allocation6], 1536  }
  0x35   : > { %1580 = vsyncadd (%p43_p1), [#allocation6], 4294965760 }
  0x36   : > { %1582 = dma.done.wait (%p43_p1), [#allocation9], 16  }
  0x37   : > { %1584 = vsyncadd (%p43_p1), [#allocation9], 4294967280  ;;  %v1187_v0 = vld [vmem:[#allocation5 + $0x30] sm:$0xf]  ;;  %v1241_v1 = vld [vmem:[#allocation5 + $0x34] sm:$0xf0] }
  0x38   : > { %v1179_v2 = vld [vmem:[#allocation5 + $0x20] sm:$0xf]  ;;  %v1188_v3 = vor.u32 %v1241_v1, %v1187_v0  ;;  %v1239_v4 = vld [vmem:[#allocation5 + $0x24] sm:$0xf0]  ;;  %v1171_v6 = vld [vmem:[#allocation5 + $0x10] sm:$0xf] }
  0x39   : > { %v1180_v5 = vor.u32 %v1239_v4, %v1179_v2  ;;  %v1240_v7 = vld [vmem:[#allocation5 + $0x34] sm:$0xf]  ;;  %v1189_v8 = vld [vmem:[#allocation5 + $0x38] sm:$0xf0]  ;;  %v1237_v9 = vld [vmem:[#allocation5 + $0x14] sm:$0xf0] }
  0x3a   : > { %327 = vmatpush.bf16.msra.mxu0 %v1188_v3  ;;  %v1192_v10 = vor.u32 %v1240_v7, %v1189_v8  ;;  %v1238_v11 = vld [vmem:[#allocation5 + $0x24] sm:$0xf]  ;;  %v1181_v12 = vld [vmem:[#allocation5 + $0x28] sm:$0xf0]  ;;  %v1172_v14 = vor.u32 %v1237_v9, %v1171_v6  ;;  %v1236_v15 = vld [vmem:[#allocation5 + $0x14] sm:$0xf] }
  0x3b   : > { %v1184_v13 = vor.u32 %v1238_v11, %v1181_v12  ;;  %v1173_v16 = vld [vmem:[#allocation5 + $0x18] sm:$0xf0]  ;;  %v1163_v17 = vld [vmem:[#allocation5] sm:$0xf]  ;;  %v1235_v18 = vld [vmem:[#allocation5 + $0x4] sm:$0xf0] }
  0x3c   : > { %341 = vmatpush.bf16.msra.mxu1 %v1192_v10  ;;  %v268_v19 = vld [vmem:[%s1774_s28] sm:$0xff]  ;;  %v1176_v20 = vor.u32 %v1236_v15, %v1173_v16  ;;  %v1164_v21 = vor.u32 %v1235_v18, %v1163_v17  ;;  %v269_v22 = vld [vmem:[%s1774_s28 + $0x8] sm:$0xff]  ;;  %vm319_vm0 = vcmask 523264   ;;  %s1612_s21 = smov 56   ;;  %s1613_s26 = smov 64   ;;  %vm364_vm1 = vcmask 64512  }
  0x3d   : > { %v1234_v23 = vld [vmem:[#allocation5 + $0x4] sm:$0xf]  ;;  %v1165_v24 = vld [vmem:[#allocation5 + $0x8] sm:$0xf0]  ;;  %v270_v25 = vpack.c.bf16 %v269_v22, %v268_v19  ;;  %vm385_vm2 = vcmask 130048   ;;  %s1614_s7 = smov 88  }
  0x3e   : > { %328 = vmatpush.bf16.msra.mxu0 %v1180_v5  ;;  %v1168_v26 = vor.u32 %v1234_v23, %v1165_v24  ;;  %s1615_s8 = smov 16   ;;  %s1616_s13 = smov 120  }
  0x3f   : > { %s1617_s20 = smov 40   ;;  %s1618_s23 = smov 48  }
  0x40   : > { %342 = vmatpush.bf16.msra.mxu1 %v1184_v13  ;;  %s1619_s24 = smov 104   ;;  %s1620_s9 = smov 112  }
  0x41   : > { %s1621_s10 = smov 24   ;;  %s1622_s29 = smov 8  }
  0x42   : > { %329 = vmatpush.bf16.msra.mxu0 %v1172_v14  ;;  %s1623_s11 = smov 32   ;;  %s1624_s12 = smov 72  }
  0x43   : > { %s1625_s27 = smov 96   ;;  %s1626_s28 = smov 80  }
  0x44   : > { %343 = vmatpush.bf16.msra.mxu1 %v1176_v20 }
  0x46   : > { %330 = vmatpush.bf16.msra.mxu0 %v1164_v21 }
  0x48   : > { %344 = vmatpush.bf16.msra.mxu1 %v1168_v26 }
  0x49   : > { %1193 = vmatmul.msk.bf16.vlgmr.msra.gmra.mxu0 %vm319_vm0, %v270_v25 }
  0x4b   : > { %1194 = vmatmul.msk.bf16.vlgmr.msra.gmra.mxu1 %vm319_vm0, %v270_v25 }
  0xc6   : > { %v332_v27 = vpop.f32.mrf.mxu0 }
  0xc7   : > { %v355_v29 = vpack.c.bf16 %v332_v27, %v332_v27 }
  0xc8   : > { %v1792_v28 = vpop.f32.mrf.mxu1 }
  0xc9   : > { %v351_v31 = vpack.c.bf16 %v1792_v28, %v1792_v28  ;;  %v359_v33 = vunpack.c.l.b16 %v355_v29 }
  0xcb   : > { %v417_v36 = vunpack.c.l.b16 %v351_v31 }
  0xce   : > { %v334_v30 = vpop.f32.mrf.mxu0 }
  0xcf   : > { %v356_v32 = vpack.c.bf16 %v334_v30, %v334_v30 }
  0xd0   : > { %v1796_v35 = vpop.f32.mrf.mxu1 }
  0xd1   : > { %v360_v34 = vunpack.c.l.b16 %v356_v32  ;;  %v352_v37 = vpack.c.bf16 %v1796_v35, %v1796_v35 }
  0xd3   : > { %v1800_v38 = vpack.c.b16 %v360_v34, %v359_v33  ;;  %v418_v39 = vunpack.c.l.b16 %v352_v37 }
  0xd5   : > { %445 = vrot.lane.b32.xlu2 %v1800_v38, %s1612_s21  ;;  %362 = vrot.lane.b32.xlu0 %v1800_v38, %s1613_s26  ;;  %v1804_v40 = vpack.c.b16 %v418_v39, %v417_v36  ;;  %s1246_s21 = sshll.u32 %s1674_s19, 4  ;;  %s265_s26 = scalar_lea.vmem [#allocation10], %s1156_s14 }
  0xd6   : > { %s1029_s19 = scalar_lea.sflag [#allocation4], %s1768_s6 }
  0xd7   : > { %431 = vmatpush.bf16.msra.mxu3 %v1804_v40  ;;  %581 = vmatpush.bf16.msrb.mxu1 %v1804_v40 }
  0xdb   : > { %731 = vmatpush.bf16.msra.mxu1 %v1804_v40 }
 0x12f   : > { %v446_v41 = vpop.permute.xlu2 %445 }
 0x130   : > { %v451_v42 = vsel %vm364_vm1, %v446_v41, 0 }
 0x131   : > { %460 = vmatpush.bf16.xpose.msrb.mxu3 %v451_v42 }
 0x147   : > { %v363_v43 = vpop.permute.xlu0 %362 }
 0x148   : > { %v369_v44 = vsel %vm364_vm1, %v363_v43, 0 }
 0x149   : > { %378 = vmatpush.bf16.xpose.msra.mxu2 %v369_v44 }
 0x150   : > { %1195 = vmatmul.msk.bf16.vlgmr.msra.gmra.mxu2 %vm364_vm1, %v1800_v38 }
 0x151   : > { %506 = vmatpush.bf16.msrb.mxu2 %v1804_v40 }
 0x155   : > { %656 = vmatpush.bf16.msra.mxu2 %v1804_v40 }
 0x1d3   : > { %v380_v45 = vpop.f32.mrf.mxu2 }
 0x1d4   : > { %v386_v46 = vsel %vm385_vm2, %v380_v45, -inf }
 0x1d5   : > { %387 = vmax.xlane.f32.xlu0 %v386_v46 }
 0x1db   : > { %v382_v47 = vpop.f32.mrf.mxu2 }
 0x1dc   : > { %v389_v48 = vsel %vm385_vm2, %v382_v47, -inf }
 0x1dd   : > { %390 = vmax.xlane.f32.xlu1 %v389_v48 }
 0x1e9   : > { %743 = vrot.lane.b32.xlu0 %v1800_v38, %s1614_s7 }
 0x1f1   : > { %820 = vrot.lane.b32.xlu0 %v1800_v38, %s1615_s8 }
 0x248   : > { %v388_v49 = vpop.xlane.xlu0 %387 }
 0x249   : > { %v392_v50 = vsub.f32 %v380_v45, %v388_v49 }
 0x24b   : > { %v394_v51 = vmul.f32 1.442695, %v392_v50 }
 0x24d   : > { %1345 = vpow2.f32 %v394_v51 }
 0x250   : > { %v391_v52 = vpop.xlane.xlu1 %390 }
 0x251   : > { %v393_v53 = vsub.f32 %v382_v47, %v391_v52 }
 0x253   : > { %v1346_v54 = vpop.eup %1345  ;;  %v396_v55 = vmul.f32 1.442695, %v393_v53 }
 0x254   : > { %v398_v56 = vsel %vm385_vm2, %v1346_v54, 0.0 }
 0x255   : > { %1347 = vpow2.f32 %v396_v55  ;;  %399 = vadd.xlane.f32.xlu1 %v398_v56 }
 0x25b   : > { %v1348_v57 = vpop.eup %1347  ;;  %v744_v10 = vpop.permute.xlu0 %743 }
 0x25c   : > { %v401_v58 = vsel %vm385_vm2, %v1348_v57, 0.0 }
 0x25d   : > { %402 = vadd.xlane.f32.xlu2 %v401_v58 }
 0x263   : > { %v821_v14 = vpop.permute.xlu0 %820 }
 0x264   : > { %v826_v19 = vsel %vm364_vm1, %v821_v14, 0 }
 0x26e   : > { %443 = vrot.lane.b32.xlu1 %v1800_v38, %s1616_s13  ;;  %s1040_s13 = scalar_lea.hbm %s2058_s4, %s1246_s21 }
 0x275   : > { %595 = vrot.lane.b32.xlu2 %v1800_v38, %s1617_s20  ;;  %s1041_s20 = sshll.u32 %s265_s26, 4  ;;  %s1042_s20 = int_to_ptr.vmem [resolvable:$true] %s1041_s20 }
 0x276   : > { %520 = vrot.lane.b32.xlu1 %v1800_v38, %s1618_s23  ;;  %s1043_s23 = sshll.u32 %s1040_s13, 4  ;;  %s1044_s23 = int_to_ptr.hbm [resolvable:$true] %s1043_s23 }
 0x27d   : > { %593 = vrot.lane.b32.xlu2 %v1800_v38, %s1619_s24  ;;  %s1543_s24 = sshra.s32 %s1044_s23, 4  ;;  %s1544_s24 = int_to_ptr.hbm [resolvable:$true] %s1543_s24 }
 0x27e   : > { %518 = vrot.lane.b32.xlu1 %v1800_v38, %s1620_s9  ;;  %s1545_s14 = scalar_lea.hbm %s1544_s24, 16  ;;  %p1550_p11 = scmp.lt.s32.totalorder %s1544_s24, %s2058_s4 }
 0x27f   : > { %p1546_p1 = scmp.ne.s32.totalorder %s1544_s24, %s1545_s14 }
 0x281   : > { %p1547_p4 = pnand %p1546_p1, %p1738_p3 }
 0x283   : > { %p1548_p8 = pneg %p1547_p4 }
 0x285   : > { %745 = vrot.lane.b32.xlu2 %v1800_v38, %s1621_s10 }
 0x286   : > { %895 = vrot.lane.b32.xlu1 %v1800_v38, %s1622_s29 }
 0x28d   : > { %670 = vrot.lane.b32.xlu2 %v1800_v38, %s1623_s11  ;;  %s1549_s11 = scalar_lea.hbm %s2058_s4, 32 }
 0x28e   : > { %893 = vrot.lane.b32.xlu1 %v1800_v38, %s1624_s12  ;;  %p1551_p9 = scmp.lt.s32.totalorder %s1549_s11, %s1545_s14 }
 0x290   : > { %p1552_p2 = por %p1551_p9, %p1550_p11 }
 0x292   : > { %p1553_p10 = pnand %p1552_p2, %p1548_p8 }
 0x295   : > { %668 = vrot.lane.b32.xlu2 %v1800_v38, %s1625_s27 }
 0x29d   : > { %818 = vrot.lane.b32.xlu2 %v1800_v38, %s1626_s28 }
 0x2c8   : > { %v400_v59 = vpop.xlane.xlu1 %399 }
 0x2c9   : > { %1349 = vrcp.f32 %v400_v59 }
 0x2cf   : > { %v1350_v61 = vpop.eup %1349 }
 0x2d0   : > { %v403_v60 = vpop.xlane.xlu2 %402  ;;  %v406_v62 = vmul.f32 %v1350_v61, %v1346_v54 }
 0x2d1   : > { %1351 = vrcp.f32 %v403_v60 }
 0x2d2   : > { %v408_v2 = vpack.c.bf16 %v406_v62, %v406_v62 }
 0x2d4   : > { %v412_v4 = vunpack.c.l.b16 %v408_v2 }
 0x2d7   : > { %v1352_v63 = vpop.eup %1351 }
 0x2d8   : > { %v596_v0 = vpop.permute.xlu2 %595  ;;  %v407_v1 = vmul.f32 %v1352_v63, %v1348_v57 }
 0x2d9   : > { %v601_v7 = vsel %vm364_vm1, %v596_v0, 0 }
 0x2da   : > { %v409_v3 = vpack.c.bf16 %v407_v1, %v407_v1 }
 0x2dc   : > { %v413_v5 = vunpack.c.l.b16 %v409_v3 }
 0x2de   : > { %v414_v6 = vpack.c.b16 %v413_v5, %v412_v4 }
 0x2e0   : > { %v594_v8 = vpop.permute.xlu2 %593  ;;  %1196 = vmatmul.msk.bf16.vlgmr.msra.gmra.mxu3 %vm385_vm2, %v414_v6  ;;  %v444_v9 = vpop.permute.xlu1 %443 }
 0x2e1   : > { %610 = vmatpush.bf16.xpose.msra.mxu3 %v601_v7 }
 0x2e8   : > { %v746_v11 = vpop.permute.xlu2 %745  ;;  %v521_v12 = vpop.permute.xlu1 %520 }
 0x2e9   : > { %v526_v13 = vsel %vm364_vm1, %v521_v12, 0  ;;  %v751_v15 = vsel %vm364_vm1, %v746_v11, 0 }
 0x2ea   : > { %535 = vmatpush.bf16.xpose.msrb.mxu0 %v526_v13 }
 0x2f0   : > { %v671_v16 = vpop.permute.xlu2 %670  ;;  %1197 = vmatmul.msk.bf16.vlgmr.msrb.gmra.mxu3 %vm364_vm1, %v444_v9  ;;  %v519_v17 = vpop.permute.xlu1 %518 }
 0x2f1   : > { %v676_v18 = vsel %vm364_vm1, %v671_v16, 0  ;;  %760 = vmatpush.bf16.xpose.msrb.mxu3 %v751_v15  ;;  %1199 = vmatmul.msk.bf16.vlgmr.msrb.gmra.mxu0 %vm364_vm1, %v519_v17 }
 0x2f2   : > { %685 = vmatpush.bf16.xpose.msra.mxu0 %v676_v18 }
 0x2f8   : > { %v896_v20 = vpop.permute.xlu1 %895  ;;  %v669_v21 = vpop.permute.xlu2 %668 }
 0x2f9   : > { %v901_v22 = vsel %vm364_vm1, %v896_v20, 0 }
 0x2fa   : > { %835 = vmatpush.bf16.xpose.msrb.mxu0 %v826_v19 }
 0x300   : > { %1201 = vmatmul.msk.bf16.vlgmr.msra.gmra.mxu3 %vm364_vm1, %v594_v8  ;;  %v819_v23 = vpop.permute.xlu2 %818  ;;  %v894_v24 = vpop.permute.xlu1 %893 }
 0x301   : > { %910 = vmatpush.bf16.xpose.msra.mxu3 %v901_v22  ;;  %1203 = vmatmul.msk.bf16.vlgmr.msra.gmra.mxu0 %vm364_vm1, %v669_v21 }
 0x310   : > { %1205 = vmatmul.msk.bf16.vlgmr.msrb.gmra.mxu3 %vm364_vm1, %v744_v10 }
 0x311   : > { %1207 = vmatmul.msk.bf16.vlgmr.msrb.gmra.mxu0 %vm364_vm1, %v819_v23 }
 0x320   : > { %1209 = vmatmul.msk.bf16.vlgmr.msra.gmra.mxu3 %vm364_vm1, %v894_v24 }
 0x363   : > { %v1847_v25 = vpop.f32.mrf.mxu3 }
 0x36b   : > { %v1849_v26 = vpop.f32.mrf.mxu3 }
 0x36e   : > { %v537_v30 = vpop.f32.mrf.mxu0 }
 0x36f   : > { %v542_v36 = vsel %vm385_vm2, %v537_v30, -inf }
 0x373   : > { %v462_v27 = vpop.f32.mrf.mxu3 }
 0x374   : > { %v467_v29 = vsel %vm385_vm2, %v462_v27, -inf }
 0x375   : > { %468 = vmax.xlane.f32.xlu1 %v467_v29 }
 0x376   : > { %v539_v37 = vpop.f32.mrf.mxu0 }
 0x377   : > { %v545_v41 = vsel %vm385_vm2, %v539_v37, -inf }
 0x37b   : > { %v464_v31 = vpop.f32.mrf.mxu3 }
 0x37c   : > { %v470_v32 = vsel %vm385_vm2, %v464_v31, -inf }
 0x37d   : > { %471 = vmax.xlane.f32.xlu0 %v470_v32 }
 0x37e   : > { %v1857_v42 = vpop.f32.mrf.mxu0 }
 0x37f   : > { %v692_v45 = vsel %vm385_vm2, %v1857_v42, -inf }
 0x383   : > { %v612_v33 = vpop.f32.mrf.mxu3 }
 0x384   : > { %v617_v34 = vsel %vm385_vm2, %v612_v33, -inf }
 0x385   : > { %618 = vmax.xlane.f32.xlu2 %v617_v34  ;;  %543 = vmax.xlane.f32.xlu0 %v542_v36 }
 0x386   : > { %v1865_v46 = vpop.f32.mrf.mxu0 }
 0x387   : > { %v695_v49 = vsel %vm385_vm2, %v1865_v46, -inf }
 0x38b   : > { %v614_v38 = vpop.f32.mrf.mxu3 }
 0x38c   : > { %v620_v39 = vsel %vm385_vm2, %v614_v38, -inf }
 0x38d   : > { %621 = vmax.xlane.f32.xlu1 %v620_v39  ;;  %546 = vmax.xlane.f32.xlu2 %v545_v41 }
 0x38e   : > { %v1881_v54 = vpop.f32.mrf.mxu0 }
 0x38f   : > { %v842_v55 = vsel %vm385_vm2, %v1881_v54, -inf }
 0x393   : > { %v1859_v43 = vpop.f32.mrf.mxu3 }
 0x394   : > { %v767_v44 = vsel %vm385_vm2, %v1859_v43, -inf }
 0x395   : > { %768 = vmax.xlane.f32.xlu1 %v767_v44  ;;  %693 = vmax.xlane.f32.xlu2 %v692_v45 }
 0x396   : > { %v1889_v2 = vpop.f32.mrf.mxu0 }
 0x397   : > { %v845_v9 = vsel %vm385_vm2, %v1889_v2, -inf }
 0x39b   : > { %v1867_v47 = vpop.f32.mrf.mxu3 }
 0x39c   : > { %v770_v48 = vsel %vm385_vm2, %v1867_v47, -inf }
 0x39d   : > { %771 = vmax.xlane.f32.xlu0 %v770_v48  ;;  %696 = vmax.xlane.f32.xlu1 %v695_v49 }
 0x3a3   : > { %v1873_v50 = vpop.f32.mrf.mxu3 }
 0x3a4   : > { %v917_v51 = vsel %vm385_vm2, %v1873_v50, -inf }
 0x3a5   : > { %918 = vmax.xlane.f32.xlu0 %v917_v51 }
 0x3ab   : > { %v1877_v52 = vpop.f32.mrf.mxu3 }
 0x3ac   : > { %v920_v53 = vsel %vm385_vm2, %v1877_v52, -inf }
 0x3ad   : > { %921 = vmax.xlane.f32.xlu2 %v920_v53 }
 0x3b5   : > { %843 = vmax.xlane.f32.xlu2 %v842_v55 }
 0x3e8   : > { %v469_v56 = vpop.xlane.xlu1 %468 }
 0x3e9   : > { %v473_v57 = vsub.f32 %v462_v27, %v469_v56 }
 0x3eb   : > { %v475_v58 = vmul.f32 1.442695, %v473_v57 }
 0x3ed   : > { %1353 = vpow2.f32 %v475_v58 }
 0x3f0   : > { %v472_v59 = vpop.xlane.xlu0 %471 }
 0x3f1   : > { %v474_v60 = vsub.f32 %v464_v31, %v472_v59 }
 0x3f3   : > { %v1885_v61 = vpop.eup %1353  ;;  %v477_v62 = vmul.f32 1.442695, %v474_v60 }
 0x3f4   : > { %v479_v63 = vsel %vm385_vm2, %v1885_v61, 0.0 }
 0x3f5   : > { %1355 = vpow2.f32 %v477_v62  ;;  %480 = vadd.xlane.f32.xlu1 %v479_v63 }
 0x3f8   : > { %v619_v0 = vpop.xlane.xlu2 %618  ;;  %v544_v1 = vpop.xlane.xlu0 %543 }
 0x3f9   : > { %v623_v3 = vsub.f32 %v612_v33, %v619_v0  ;;  %v548_v4 = vsub.f32 %v537_v30, %v544_v1 }
 0x3fb   : > { %v1891_v5 = vpop.eup %1355  ;;  %v625_v6 = vmul.f32 1.442695, %v623_v3  ;;  %v550_v7 = vmul.f32 1.442695, %v548_v4 }
 0x3fc   : > { %v482_v8 = vsel %vm385_vm2, %v1891_v5, 0.0 }
 0x3fd   : > { %1357 = vpow2.f32 %v625_v6  ;;  %483 = vadd.xlane.f32.xlu0 %v482_v8  ;;  %846 = vmax.xlane.f32.xlu1 %v845_v9 }
 0x3fe   : > { %1359 = vpow2.f32 %v550_v7 }
 0x400   : > { %v547_v10 = vpop.xlane.xlu2 %546  ;;  %v622_v11 = vpop.xlane.xlu1 %621 }
 0x401   : > { %v549_v12 = vsub.f32 %v539_v37, %v547_v10  ;;  %v624_v13 = vsub.f32 %v614_v38, %v622_v11 }
 0x403   : > { %v1897_v14 = vpop.eup %1357  ;;  %v552_v15 = vmul.f32 1.442695, %v549_v12  ;;  %v627_v16 = vmul.f32 1.442695, %v624_v13 }
 0x404   : > { %v1899_v17 = vpop.eup %1359  ;;  %v629_v18 = vsel %vm385_vm2, %v1897_v14, 0.0 }
 0x405   : > { %1361 = vpow2.f32 %v552_v15  ;;  %630 = vadd.xlane.f32.xlu0 %v629_v18  ;;  %v554_v19 = vsel %vm385_vm2, %v1899_v17, 0.0 }
 0x406   : > { %1363 = vpow2.f32 %v627_v16  ;;  %555 = vadd.xlane.f32.xlu1 %v554_v19 }
 0x408   : > { %v694_v20 = vpop.xlane.xlu2 %693  ;;  %v769_v21 = vpop.xlane.xlu1 %768 }
 0x409   : > { %v698_v22 = vsub.f32 %v1857_v42, %v694_v20  ;;  %v773_v23 = vsub.f32 %v1859_v43, %v769_v21 }
 0x40b   : > { %v1907_v24 = vpop.eup %1361  ;;  %v700_v27 = vmul.f32 1.442695, %v698_v22  ;;  %v775_v29 = vmul.f32 1.442695, %v773_v23 }
 0x40c   : > { %v1909_v30 = vpop.eup %1363  ;;  %v557_v31 = vsel %vm385_vm2, %v1907_v24, 0.0 }
 0x40d   : > { %1365 = vpow2.f32 %v700_v27  ;;  %558 = vadd.xlane.f32.xlu0 %v557_v31  ;;  %v632_v32 = vsel %vm385_vm2, %v1909_v30, 0.0 }
 0x40e   : > { %1367 = vpow2.f32 %v775_v29  ;;  %633 = vadd.xlane.f32.xlu2 %v632_v32 }
 0x410   : > { %v772_v33 = vpop.xlane.xlu0 %771  ;;  %v697_v34 = vpop.xlane.xlu1 %696 }
 0x411   : > { %v774_v36 = vsub.f32 %v1867_v47, %v772_v33  ;;  %v699_v37 = vsub.f32 %v1865_v46, %v697_v34 }
 0x413   : > { %v1917_v38 = vpop.eup %1365  ;;  %v777_v39 = vmul.f32 1.442695, %v774_v36  ;;  %v702_v41 = vmul.f32 1.442695, %v699_v37 }
 0x414   : > { %v1919_v42 = vpop.eup %1367  ;;  %v704_v43 = vsel %vm385_vm2, %v1917_v38, 0.0 }
 0x415   : > { %1369 = vpow2.f32 %v777_v39  ;;  %705 = vadd.xlane.f32.xlu0 %v704_v43  ;;  %v779_v44 = vsel %vm385_vm2, %v1919_v42, 0.0 }
 0x416   : > { %1371 = vpow2.f32 %v702_v41  ;;  %780 = vadd.xlane.f32.xlu2 %v779_v44 }
 0x418   : > { %v919_v45 = vpop.xlane.xlu0 %918 }
 0x419   : > { %v923_v47 = vsub.f32 %v1873_v50, %v919_v45 }
 0x41b   : > { %v1926_v46 = vpop.eup %1369  ;;  %v925_v48 = vmul.f32 1.442695, %v923_v47 }
 0x41c   : > { %v1928_v49 = vpop.eup %1371  ;;  %v782_v51 = vsel %vm385_vm2, %v1926_v46, 0.0 }
 0x41d   : > { %1373 = vpow2.f32 %v925_v48  ;;  %783 = vadd.xlane.f32.xlu1 %v782_v51  ;;  %v707_v53 = vsel %vm385_vm2, %v1928_v49, 0.0 }
 0x41e   : > { %708 = vadd.xlane.f32.xlu2 %v707_v53 }
 0x420   : > { %v922_v55 = vpop.xlane.xlu2 %921 }
 0x421   : > { %v924_v56 = vsub.f32 %v1877_v52, %v922_v55 }
 0x423   : > { %v1935_v57 = vpop.eup %1373  ;;  %v927_v50 = vmul.f32 1.442695, %v924_v56 }
 0x424   : > { %v929_v58 = vsel %vm385_vm2, %v1935_v57, 0.0 }
 0x425   : > { %1375 = vpow2.f32 %v927_v50  ;;  %930 = vadd.xlane.f32.xlu1 %v929_v58 }
 0x428   : > { %v844_v59 = vpop.xlane.xlu2 %843 }
 0x429   : > { %v848_v60 = vsub.f32 %v1881_v54, %v844_v59 }
 0x42b   : > { %v1940_v62 = vpop.eup %1375  ;;  %v850_v63 = vmul.f32 1.442695, %v848_v60 }
 0x42c   : > { %v932_v0 = vsel %vm385_vm2, %v1940_v62, 0.0 }
 0x42d   : > { %1377 = vpow2.f32 %v850_v63  ;;  %933 = vadd.xlane.f32.xlu0 %v932_v0 }
 0x433   : > { %v1944_v52 = vpop.eup %1377 }
 0x434   : > { %v854_v1 = vsel %vm385_vm2, %v1944_v52, 0.0 }
 0x435   : > { %855 = vadd.xlane.f32.xlu2 %v854_v1 }
 0x468   : > { %v481_v3 = vpop.xlane.xlu1 %480 }
 0x469   : > { %1379 = vrcp.f32 %v481_v3 }
 0x46f   : > { %v1380_v7 = vpop.eup %1379 }
 0x470   : > { %v484_v4 = vpop.xlane.xlu0 %483  ;;  %v847_v6 = vpop.xlane.xlu1 %846  ;;  %v487_v9 = vmul.f32 %v1380_v7, %v1885_v61 }
 0x471   : > { %1381 = vrcp.f32 %v484_v4  ;;  %v849_v54 = vsub.f32 %v1889_v2, %v847_v6 }
 0x472   : > { %v489_v11 = vpack.c.bf16 %v487_v9, %v487_v9 }
 0x473   : > { %v852_v8 = vmul.f32 1.442695, %v849_v54 }
 0x474   : > { %v493_v19 = vunpack.c.l.b16 %v489_v11 }
 0x475   : > { %1383 = vpow2.f32 %v852_v8 }
 0x477   : > { %v1382_v10 = vpop.eup %1381 }
 0x478   : > { %v488_v12 = vmul.f32 %v1382_v10, %v1891_v5  ;;  %v631_v13 = vpop.xlane.xlu0 %630 }
 0x479   : > { %v556_v15 = vpop.xlane.xlu1 %555 }
 0x47a   : > { %v490_v16 = vpack.c.bf16 %v488_v12, %v488_v12  ;;  %1385 = vrcp.f32 %v556_v15 }
 0x47b   : > { %v1951_v18 = vpop.eup %1383  ;;  %1387 = vrcp.f32 %v631_v13 }
 0x47c   : > { %v494_v20 = vunpack.c.l.b16 %v490_v16  ;;  %v857_v2 = vsel %vm385_vm2, %v1951_v18, 0.0 }
 0x47d   : > { %858 = vadd.xlane.f32.xlu1 %v857_v2 }
 0x47e   : > { %v495_v21 = vpack.c.b16 %v494_v20, %v493_v19 }
 0x480   : > { %v559_v61 = vpop.xlane.xlu0 %558  ;;  %1198 = vmatmul.msk.bf16.vlgmr.msrb.gmra.mxu2 %vm385_vm2, %v495_v21  ;;  %v1386_v22 = vpop.eup %1385 }
 0x481   : > { %1389 = vrcp.f32 %v559_v61  ;;  %v634_v5 = vpop.xlane.xlu2 %633  ;;  %806 = vmatpush.bf16.msrb.mxu2 %v1804_v40  ;;  %v1388_v23 = vpop.eup %1387  ;;  %v562_v27 = vmul.f32 %v1386_v22, %v1899_v17 }
 0x482   : > { %1391 = vrcp.f32 %v634_v5  ;;  %v637_v29 = vmul.f32 %v1388_v23, %v1897_v14 }
 0x483   : > { %v564_v33 = vpack.c.bf16 %v562_v27, %v562_v27 }
 0x484   : > { %v639_v36 = vpack.c.bf16 %v637_v29, %v637_v29 }
 0x485   : > { %v568_v45 = vunpack.c.l.b16 %v564_v33 }
 0x486   : > { %v643_v48 = vunpack.c.l.b16 %v639_v36 }
 0x487   : > { %v1390_v31 = vpop.eup %1389 }
 0x488   : > { %v1392_v32 = vpop.eup %1391  ;;  %v563_v34 = vmul.f32 %v1390_v31, %v1907_v24  ;;  %v706_v39 = vpop.xlane.xlu0 %705  ;;  %v1245_v31 = vld [vmem:[#allocation7 + $0x18] sm:$0xff] }
 0x489   : > { %v638_v37 = vmul.f32 %v1392_v32, %v1909_v30  ;;  %v781_v41 = vpop.xlane.xlu2 %780  ;;  %1008 = vmatpush.bf16.msra.mxu0 %v1245_v31 }
 0x48a   : > { %v565_v43 = vpack.c.bf16 %v563_v34, %v563_v34  ;;  %1393 = vrcp.f32 %v781_v41 }
 0x48b   : > { %v640_v44 = vpack.c.bf16 %v638_v37, %v638_v37  ;;  %1395 = vrcp.f32 %v706_v39  ;;  %v1244_v39 = vld [vmem:[#allocation7 + $0x10] sm:$0xff] }
 0x48c   : > { %v569_v47 = vunpack.c.l.b16 %v565_v43  ;;  %v1242_v43 = vld [vmem:[#allocation7] sm:$0xff] }
 0x48d   : > { %v644_v17 = vunpack.c.l.b16 %v640_v44  ;;  %1009 = vmatpush.bf16.msra.mxu0 %v1244_v39 }
 0x48e   : > { %v570_v51 = vpack.c.b16 %v569_v47, %v568_v45  ;;  %v353_v47 = vlaneseq }
 0x48f   : > { %v645_v14 = vpack.c.b16 %v644_v17, %v643_v48 }
 0x490   : > { %1200 = vmatmul.msk.bf16.vlgmr.msrb.gmra.mxu1 %vm385_vm2, %v570_v51  ;;  %v784_v53 = vpop.xlane.xlu1 %783  ;;  %v1394_v55 = vpop.eup %1393  ;;  %v354_v17 = vand.u32 127, %v353_v47 }
 0x491   : > { %v709_v24 = vpop.xlane.xlu2 %708  ;;  %1202 = vmatmul.msk.bf16.vlgmr.msra.gmra.mxu2 %vm385_vm2, %v645_v14  ;;  %881 = vmatpush.bf16.msrb.mxu1 %v1804_v40  ;;  %1397 = vrcp.f32 %v784_v53  ;;  %v1396_v30 = vpop.eup %1395  ;;  %v787_v56 = vmul.f32 %v1394_v55, %v1919_v42 }
 0x492   : > { %1399 = vrcp.f32 %v709_v24  ;;  %956 = vmatpush.bf16.msra.mxu2 %v1804_v40  ;;  %v712_v50 = vmul.f32 %v1396_v30, %v1917_v38  ;;  %vm513_vm3 = vcmp.ge.s32.totalorder %v354_v17, 8  ;;  %vm514_vm4 = vcmp.lt.s32.totalorder %v354_v17, 16 }
 0x493   : > { %v789_v60 = vpack.c.bf16 %v787_v56, %v787_v56  ;;  %vm588_vm5 = vcmp.ge.s32.totalorder %v354_v17, 16  ;;  %vm589_vm6 = vcmp.lt.s32.totalorder %v354_v17, 24  ;;  %vm439_vm7 = vcmp.lt.s32.totalorder %v354_v17, 8  ;;  %vm1977_vm10 = vmand %vm513_vm3, %vm514_vm4 }
 0x494   : > { %v714_v1 = vpack.c.bf16 %v712_v50, %v712_v50  ;;  %vm663_vm8 = vcmp.ge.s32.totalorder %v354_v17, 24  ;;  %vm664_vm9 = vcmp.lt.s32.totalorder %v354_v17, 32  ;;  %vm738_vm11 = vcmp.ge.s32.totalorder %v354_v17, 32  ;;  %vm1981_vm13 = vmand %vm588_vm5, %vm589_vm6 }
 0x495   : > { %v793_v7 = vunpack.c.l.b16 %v789_v60  ;;  %vm739_vm12 = vcmp.lt.s32.totalorder %v354_v17, 40  ;;  %vm813_vm14 = vcmp.ge.s32.totalorder %v354_v17, 40  ;;  %vm814_vm15 = vcmp.lt.s32.totalorder %v354_v17, 48  ;;  %vm1987_vm1 = vmand %vm663_vm8, %vm664_vm9 }
 0x496   : > { %v718_v8 = vunpack.c.l.b16 %v714_v1  ;;  %v441_v24 = vsel %vm439_vm7, %v1847_v25, 0.0  ;;  %vm889_vm3 = vcmp.lt.s32.totalorder %v354_v17, 56  ;;  %vm740_vm4 = vmand %vm738_vm11, %vm739_vm12  ;;  %v442_v50 = vsel %vm439_vm7, %v1849_v26, 0.0 }
 0x497   : > { %v1398_v58 = vpop.eup %1397  ;;  %vm1997_vm5 = vmand %vm813_vm14, %vm814_vm15  ;;  %vm963_vm8 = vcmp.ge.s32.totalorder %v354_v17, 56  ;;  %vm964_vm9 = vcmp.lt.s32.totalorder %v354_v17, 64 }
 0x498   : > { %v1400_v59 = vpop.eup %1399  ;;  %v788_v63 = vmul.f32 %v1398_v58, %v1926_v46  ;;  %v931_v0 = vpop.xlane.xlu1 %930  ;;  %vm965_vm7 = vmand %vm963_vm8, %vm964_vm9 }
 0x499   : > { %v713_v3 = vmul.f32 %v1400_v59, %v1928_v49  ;;  %1401 = vrcp.f32 %v931_v0 }
 0x49a   : > { %v790_v4 = vpack.c.bf16 %v788_v63, %v788_v63 }
 0x49b   : > { %v715_v6 = vpack.c.bf16 %v713_v3, %v713_v3 }
 0x49c   : > { %v794_v54 = vunpack.c.l.b16 %v790_v4 }
 0x49d   : > { %v719_v40 = vunpack.c.l.b16 %v715_v6 }
 0x49e   : > { %v795_v9 = vpack.c.b16 %v794_v54, %v793_v7 }
 0x49f   : > { %v720_v42 = vpack.c.b16 %v719_v40, %v718_v8  ;;  %v1402_v38 = vpop.eup %1401 }
 0x4a0   : > { %v934_v10 = vpop.xlane.xlu0 %933  ;;  %v937_v46 = vmul.f32 %v1402_v38, %v1935_v57 }
 0x4a1   : > { %1403 = vrcp.f32 %v934_v10  ;;  %1204 = vmatmul.msk.bf16.vlgmr.msra.gmra.mxu1 %vm385_vm2, %v720_v42  ;;  %1206 = vmatmul.msk.bf16.vlgmr.msrb.gmra.mxu2 %vm385_vm2, %v795_v9  ;;  %v1344_v10 = vld [vmem:[#allocation8] ss:$0 sm:$0xff] }
 0x4a2   : > { %v939_v49 = vpack.c.bf16 %v937_v46, %v937_v46 }
 0x4a4   : > { %v943_v15 = vunpack.c.l.b16 %v939_v49 }
 0x4a7   : > { %v1404_v11 = vpop.eup %1403 }
 0x4a8   : > { %v938_v12 = vmul.f32 %v1404_v11, %v1940_v62  ;;  %v856_v20 = vpop.xlane.xlu2 %855 }
 0x4a9   : > { %1405 = vrcp.f32 %v856_v20 }
 0x4aa   : > { %v940_v13 = vpack.c.bf16 %v938_v12, %v938_v12 }
 0x4ac   : > { %v944_v16 = vunpack.c.l.b16 %v940_v13 }
 0x4ae   : > { %v945_v19 = vpack.c.b16 %v944_v16, %v943_v15 }
 0x4af   : > { %v1406_v21 = vpop.eup %1405 }
 0x4b0   : > { %v862_v61 = vmul.f32 %v1406_v21, %v1944_v52  ;;  %v1243_v52 = vld [vmem:[#allocation7 + $0x8] sm:$0xff] }
 0x4b1   : > { %1210 = vmatmul.msk.bf16.vlgmr.msra.gmra.mxu2 %vm385_vm2, %v945_v19  ;;  %1010 = vmatpush.bf16.msra.mxu0 %v1243_v52 }
 0x4b2   : > { %v864_v5 = vpack.c.bf16 %v862_v61, %v862_v61 }
 0x4b4   : > { %v868_v27 = vunpack.c.l.b16 %v864_v5 }
 0x4b5   : > { %1011 = vmatpush.bf16.msra.mxu0 %v1242_v43 }
 0x4f0   : > { %v859_v2 = vpop.xlane.xlu1 %858 }
 0x4f1   : > { %1407 = vrcp.f32 %v859_v2 }
 0x4f7   : > { %v1408_v22 = vpop.eup %1407 }
 0x4f8   : > { %v863_v57 = vmul.f32 %v1408_v22, %v1951_v18 }
 0x4fa   : > { %v865_v23 = vpack.c.bf16 %v863_v57, %v863_v57 }
 0x4fc   : > { %v869_v62 = vunpack.c.l.b16 %v865_v23 }
 0x4fe   : > { %v870_v29 = vpack.c.b16 %v869_v62, %v868_v27 }
 0x500   : > { %1208 = vmatmul.msk.bf16.vlgmr.msrb.gmra.mxu1 %vm385_vm2, %v870_v29  ;;  %vm888_vm2 = vcmp.ge.s32.totalorder %v354_v17, 48 }
 0x501   : > { %vm890_vm6 = vmand %vm888_vm2, %vm889_vm3 }
 0x503   : > { %v508_v32 = vpop.f32.mrf.mxu2 }
 0x504   : > { %v516_v56 = vsel %vm1977_vm10, %v508_v32, %v441_v24 }
 0x50b   : > { %v510_v33 = vpop.f32.mrf.mxu2 }
 0x50c   : > { %v517_v25 = vsel %vm1977_vm10, %v510_v33, %v442_v50 }
 0x50d   : > { %v583_v36 = vpop.f32.mrf.mxu1 }
 0x50e   : > { %v591_v58 = vsel %vm1981_vm13, %v583_v36, %v516_v56 }
 0x514   : > { %v658_v34 = vpop.f32.mrf.mxu2 }
 0x515   : > { %v585_v41 = vpop.f32.mrf.mxu1  ;;  %v666_v60 = vsel %vm1987_vm1, %v658_v34, %v591_v58 }
 0x516   : > { %v592_v63 = vsel %vm1981_vm13, %v585_v41, %v517_v25 }
 0x51c   : > { %v660_v37 = vpop.f32.mrf.mxu2 }
 0x51d   : > { %v667_v0 = vsel %vm1987_vm1, %v660_v37, %v592_v63 }
 0x51e   : > { %v733_v44 = vpop.f32.mrf.mxu1 }
 0x51f   : > { %v741_v26 = vsel %vm740_vm4, %v733_v44, %v666_v60 }
 0x524   : > { %v808_v18 = vpop.f32.mrf.mxu2 }
 0x525   : > { %v816_v1 = vsel %vm1997_vm5, %v808_v18, %v741_v26 }
 0x526   : > { %v735_v48 = vpop.f32.mrf.mxu1 }
 0x527   : > { %v742_v3 = vsel %vm740_vm4, %v735_v48, %v667_v0 }
 0x52c   : > { %v810_v45 = vpop.f32.mrf.mxu2 }
 0x52d   : > { %v817_v6 = vsel %vm1997_vm5, %v810_v45, %v742_v3 }
 0x534   : > { %v958_v14 = vpop.f32.mrf.mxu2 }
 0x53c   : > { %v960_v54 = vpop.f32.mrf.mxu2 }
 0x57d   : > { %v883_v55 = vpop.f32.mrf.mxu1 }
 0x57e   : > { %v891_v4 = vsel %vm890_vm6, %v883_v55, %v816_v1 }
 0x57f   : > { %v966_v40 = vsel %vm965_vm7, %v958_v14, %v891_v4 }
 0x585   : > { %v885_v7 = vpop.f32.mrf.mxu1 }
 0x586   : > { %v892_v8 = vsel %vm890_vm6, %v885_v7, %v817_v6 }
 0x587   : > { %v967_v9 = vsel %vm965_vm7, %v960_v54, %v892_v8 }
 0x588   : > { %v968_v42 = vpack.c.bf16 %v967_v9, %v966_v40 }
 0x58a   : > { %1227 = vmatmul.msk.bf16.vlgmr.msra.gmra.mxu0 %vm319_vm0, %v968_v42 }
 0x607   : > { %v1013_v38 = vpop.f32.mrf.mxu0 }
 0x608   : > { %v1018_v46 = vadd.f32 %v1013_v38, %v1792_v28 }
 0x60a   : > { %v1024_v11 = vadd.f32 %v1344_v10, %v1018_v46 }
 0x60c   : > { %1026 = vst.msk [vmem:[%s265_s26] sm:$0xff] %vm319_vm0, %v1024_v11 }
 0x60f   : > { %v1015_v49 = vpop.f32.mrf.mxu0 }
 0x610   : > { %v1019_v12 = vadd.f32 %v1015_v49, %v1796_v35 }
 0x612   : > { %v1025_v13 = vadd.f32 %v1344_v10, %v1019_v12 }
 0x614   : > { %1027 = vst.msk [vmem:[%s265_s26 + $0x8] sm:$0xff] %vm319_vm0, %v1025_v13 }
 0x615   : > { %1556 = shalt.err (!%p1553_p10)
}
 0x616   : > { %s1627_s6 = smov 128  }
 0x617   : > { %1261 = dma.vmem_to_hbm [thread:$0]  (%p1738_p3), %s1042_s20, 256, %s1044_s23, %s1029_s19, %s1627_s6, %s1627_s6, %s1622_s29  }
 0x618 PF: > { %s1058_s28 = sand.u32 1, %s1591_s15   ;;  %p2073_p12 = scmp.ge.s32.totalorder %s1603_s18, 2 }
 0x619   : > { %s1059_s21 = scalar_lea.sflag [#allocation4], %s1058_s28 }
 0x61a   : > { %p1278_p13 = pnand %p2073_p12, %p1688_p6 }
 0x61c   : > { %p1279_p0 = pneg %p1278_p13 }
 0x61e   : > { %1586 = dma.done.wait (%p1279_p0), %s1059_s21, 256  }
 0x61f   : > { %1588 = vsyncadd (%p1279_p0), %s1059_s21, 4294967040  ;;  %p19_p5 = scmp.ge.s32.totalorder %s1725_s25, 4   ;;  %s2074_s15 = smov %s1595_s16 }
 0x620   : > { %s2075_s16 = smov %s1599_s17  ;;  %s2076_s17 = smov %s1734_s30 }
 0x621   : > { %s2077_s18 = smov %s1725_s25  ;;  %21 = sbr.rel (!%p19_p5) target bundleno = 7 (0x7), region = 93 }
 0x626   :  { %1065 = vsyncpa [#allocation3], 1 }
 0x627   :  { %1067 = vsyncpa [#allocation3 + $0x1], 1 }
 0x628   :  { %1068 = vsyncpa [#allocation6], 1 }
 0x629   :  { %1069 = vsyncpa [#allocation9], 1 }
 0x62a   :  { %1070 = vsyncpa [#allocation4], 1 }
 0x62b   :  { %1072 = vsyncpa [#allocation4 + $0x1], 1 }

</bundles_post_ra>
